<compile_context>
chip_gen: v6e
topology: v6e:2x2x1
jax: 0.10.0
libtpu: 0.0.40
codegen_flags: <defaults>
</compile_context>

<pallas_src>
import functools

import jax
import jax.numpy as jnp
from jax.experimental import pallas as pl
from jax.experimental.pallas import tpu as pltpu


def _round_up(n, m):
    return ((n + m - 1) // m) * m


def mlp_kernel(x_ref, w1_ref, b1_ref, w2_ref, b2_ref, w3_ref, b3_ref,
               wo_ref, bo_ref, out_ref, *, matmul_dtype):
    """One batch tile; batch on lanes, activations shaped (H, B_tile).

    Padded batch lanes (beyond the real B) just compute tanh of bias-only
    values and are sliced off by the wrapper — harmless, no NaN risk, and
    nothing in here reduces over the lane axis, so padding never leaks.
    """
    x = x_ref[...]                                                  # (1, Bt)

    # Layer 1: fan_in == 1 -> outer product on the VPU (no MXU round trip).
    z1 = jnp.tanh(w1_ref[...] * x + b1_ref[...])                    # (H,1)*(1,Bt) -> (H,Bt)

    # Hidden layers: real (H,H) matmuls -> MXU.  Operands cast to `matmul_dtype`
    # (bf16 by default) to avoid multi-pass f32 MXU handling; accumulate in f32.
    w2 = w2_ref[...].astype(matmul_dtype)
    w3 = w3_ref[...].astype(matmul_dtype)

    z2 = jnp.tanh(jnp.dot(w2, z1.astype(matmul_dtype),
                          preferred_element_type=jnp.float32) + b2_ref[...])
    z3 = jnp.tanh(jnp.dot(w3, z2.astype(matmul_dtype),
                          preferred_element_type=jnp.float32) + b3_ref[...])
    # Reference module re-applies hidden_layer_3 here (hidden_layer_4 unused).
    z4 = jnp.tanh(jnp.dot(w3, z3.astype(matmul_dtype),
                          preferred_element_type=jnp.float32) + b3_ref[...])

    # Output layer: fan_out == 1 -> elementwise mul + sublane reduce (VPU/XLU),
    # producing a lane-dense (1, Bt) row -> unmasked vector stores.
    out_ref[...] = jnp.sum(wo_ref[...] * z4, axis=0, keepdims=True) + bo_ref[...]


def simple_mlp_forward(x, params, *, block_b=8192, matmul_dtype=jnp.bfloat16):
    """x: (B,) or (B, 1) float32.  Returns (B, 1) float32 (matches torch forward).

    block_b: max lane-tile size (multiple of 128).  8192 keeps per-step VMEM
    (~6 live (32, bt) f32/bf16 intermediates ~= 8-10 MB) safely under v7x's
    64 MiB; v5e/v6e (128 MiB) can go higher if desired.
    matmul_dtype: dtype for the three (H,H) MXU matmuls (f32 accumulation).
    Use jnp.float32 for bit-tight validation, jnp.bfloat16 for speed.
    """
    x_flat = x.reshape(-1).astype(jnp.float32)
    B = x_flat.shape[0]

    # Lane-dense batch tiling: pad B to a multiple of 128 lanes.  Whenever the
    # batch spans more than one 128-lane group, split it into >=2 grid steps so
    # the "parallel" axis can shard across v7x's two TensorCores (no-op on
    # v5e/v6e which have a single TC).
    b128 = _round_up(B, 128)
    if b128 >= 256:
        half = _round_up((b128 + 1) // 2, 128)
        bt = max(128, min(block_b, half))
    else:
        bt = b128                                   # tiny batch: single 128-lane tile
    padded_b = _round_up(B, bt)
    grid = (padded_b // bt,)

    x_row = jnp.pad(x_flat, (0, padded_b - B)).reshape(1, padded_b)

    operands = (
        x_row,
        params["w1"], params["b1"],    # (H,1), (H,1)
        params["w2"], params["b2"],    # (H,H), (H,1)
        params["w3"], params["b3"],    # (H,H), (H,1)
        params["wo"], params["bo"],    # (H,1)  [torch output weight transposed], (1,1)
    )

    def pinned(shape):
        # Full-array block, constant index -> stays VMEM-resident across grid steps.
        return pl.BlockSpec(shape, lambda i, _s=shape: tuple(0 for _ in _s))

    in_specs = [pl.BlockSpec((1, bt), lambda i: (0, i))] + \
               [pinned(op.shape) for op in operands[1:]]

    out = pl.pallas_call(
        functools.partial(mlp_kernel, matmul_dtype=matmul_dtype),
        out_shape=jax.ShapeDtypeStruct((1, padded_b), jnp.float32),
        grid=grid,
        in_specs=in_specs,
        out_specs=pl.BlockSpec((1, bt), lambda i: (0, i)),
        compiler_params=pltpu.CompilerParams(
            # Batch tiles are independent -> shard across TensorCores on v7x.
            dimension_semantics=("parallel",),
        ),
    )(*operands)

    return out[0, :B].reshape(B, 1)


def init_params(key, hidden_size=32):
    """Deterministic init mimicking torch.nn.Linear (U(-1/sqrt(fan_in), +1/sqrt(fan_in)))."""
    def linear(key, fan_in, fan_out):
        kw, kb = jax.random.split(key)
        bound = 1.0 / jnp.sqrt(jnp.float32(fan_in))
        w = jax.random.uniform(kw, (fan_out, fan_in), jnp.float32, -bound, bound)
        b = jax.random.uniform(kb, (fan_out, 1), jnp.float32, -bound, bound)
        return w, b

    k1, k2, k3, k4, ko = jax.random.split(key, 5)
    w1, b1 = linear(k1, 1, hidden_size)                 # (H,1), (H,1)
    w2, b2 = linear(k2, hidden_size, hidden_size)
    w3, b3 = linear(k3, hidden_size, hidden_size)
    w4, b4 = linear(k4, hidden_size, hidden_size)       # created but unused (matches reference)
    wo, bo = linear(ko, hidden_size, 1)                 # (1,H), (1,1)
    return {"w1": w1, "b1": b1, "w2": w2, "b2": b2,
            "w3": w3, "b3": b3, "w4": w4, "b4": b4,
            "wo": wo.T,            # stored as (H,1) column for lane-friendly broadcast
            "bo": bo}


def reference_forward(x, p):
    """Plain-JAX reference of the (layer-3-twice) PyTorch forward, for verification."""
    x = x.reshape(-1, 1)
    z1 = jnp.tanh(x @ p["w1"].T + p["b1"].T)
    z2 = jnp.tanh(z1 @ p["w2"].T + p["b2"].T)
    z3 = jnp.tanh(z2 @ p["w3"].T + p["b3"].T)
    z4 = jnp.tanh(z3 @ p["w3"].T + p["b3"].T)
    return z4 @ p["wo"] + p["bo"]


if __name__ == "__main__":
    key = jax.random.PRNGKey(0)
    k_param, k_x1, k_x2 = jax.random.split(key, 3)

    hidden_size = 32
    params = init_params(k_param, hidden_size=hidden_size)

    # Case 1: tiny batch (single 128-lane tile, grid=(1,)).
    x_small = jax.random.normal(k_x1, (8, 1), jnp.float32)
    # Case 2: batch large enough to exercise padding + a multi-step (2-tile) grid.
    x_multi = jax.random.normal(k_x2, (300, 1), jnp.float32)

    for x in (x_small, x_multi):
        ref = reference_forward(x, params)

        # f32 matmul path: bit-tight validation of the kernel structure.
        out_f32 = jax.block_until_ready(
            simple_mlp_forward(x, params, matmul_dtype=jnp.float32))
        assert out_f32.shape == (x.shape[0], 1)
        assert jnp.allclose(out_f32, ref, atol=1e-5, rtol=1e-5)

        # bf16 matmul path (performance default): relaxed tolerance.
        out_bf16 = jax.block_until_ready(
            simple_mlp_forward(x, params, matmul_dtype=jnp.bfloat16))
        assert out_bf16.shape == (x.shape[0], 1)
        assert jnp.allclose(out_bf16, ref, atol=5e-2, rtol=5e-2)

    print("KERNEL_OK")
</pallas_src>

<mosaic_0001>
module attributes {stable_mosaic.version = 11 : i64} {
  func.func @mlp_kernel(%arg0: i32, %arg1: memref<1x128xf32, #tpu.memory_space<vmem>>, %arg2: memref<32x1xf32, #tpu.memory_space<vmem>>, %arg3: memref<32x1xf32, #tpu.memory_space<vmem>>, %arg4: memref<32x32xf32, #tpu.memory_space<vmem>>, %arg5: memref<32x1xf32, #tpu.memory_space<vmem>>, %arg6: memref<32x32xf32, #tpu.memory_space<vmem>>, %arg7: memref<32x1xf32, #tpu.memory_space<vmem>>, %arg8: memref<32x1xf32, #tpu.memory_space<vmem>>, %arg9: memref<1x1xf32, #tpu.memory_space<vmem>>, %arg10: memref<1x128xf32, #tpu.memory_space<vmem>>) attributes {dimension_semantics = [#tpu.dimension_semantics<parallel>], iteration_bounds = array<i64: 1>, scalar_prefetch = 0 : i64, scratch_operands = 0 : i64, tpu.core_type = #tpu.core_type<tc>, window_params = [{transform_indices = @transform_0, window_bounds = array<i64: 1, 128>}, {pipeline_mode = #tpu.pipeline_mode<synchronous>, transform_indices = @transform_1, window_bounds = array<i64: 32, 1>}, {pipeline_mode = #tpu.pipeline_mode<synchronous>, transform_indices = @transform_2, window_bounds = array<i64: 32, 1>}, {pipeline_mode = #tpu.pipeline_mode<synchronous>, transform_indices = @transform_3, window_bounds = array<i64: 32, 32>}, {pipeline_mode = #tpu.pipeline_mode<synchronous>, transform_indices = @transform_4, window_bounds = array<i64: 32, 1>}, {pipeline_mode = #tpu.pipeline_mode<synchronous>, transform_indices = @transform_5, window_bounds = array<i64: 32, 32>}, {pipeline_mode = #tpu.pipeline_mode<synchronous>, transform_indices = @transform_6, window_bounds = array<i64: 32, 1>}, {pipeline_mode = #tpu.pipeline_mode<synchronous>, transform_indices = @transform_7, window_bounds = array<i64: 32, 1>}, {pipeline_mode = #tpu.pipeline_mode<synchronous>, transform_indices = @transform_8, window_bounds = array<i64: 1, 1>}, {transform_indices = @transform_9, window_bounds = array<i64: 1, 128>}]} {
    %c0 = arith.constant 0 : index
    %c0_0 = arith.constant 0 : index
    %0 = vector.load %arg1[%c0, %c0_0] : memref<1x128xf32, #tpu.memory_space<vmem>>, vector<1x128xf32>
    %c0_1 = arith.constant 0 : index
    %c0_2 = arith.constant 0 : index
    %1 = vector.load %arg2[%c0_1, %c0_2] : memref<32x1xf32, #tpu.memory_space<vmem>>, vector<32x1xf32>
    %2 = vector.broadcast %1 : vector<32x1xf32> to vector<32x128xf32>
    %3 = vector.broadcast %0 : vector<1x128xf32> to vector<32x128xf32>
    %4 = arith.mulf %2, %3 : vector<32x128xf32>
    %c0_3 = arith.constant 0 : index
    %c0_4 = arith.constant 0 : index
    %5 = vector.load %arg3[%c0_3, %c0_4] : memref<32x1xf32, #tpu.memory_space<vmem>>, vector<32x1xf32>
    %6 = vector.broadcast %5 : vector<32x1xf32> to vector<32x128xf32>
    %7 = arith.addf %4, %6 : vector<32x128xf32>
    %8 = math.tanh %7 : vector<32x128xf32>
    %c0_5 = arith.constant 0 : index
    %c0_6 = arith.constant 0 : index
    %9 = vector.load %arg4[%c0_5, %c0_6] : memref<32x32xf32, #tpu.memory_space<vmem>>, vector<32x32xf32>
    %c0_7 = arith.constant 0 : index
    %c0_8 = arith.constant 0 : index
    %10 = vector.load %arg6[%c0_7, %c0_8] : memref<32x32xf32, #tpu.memory_space<vmem>>, vector<32x32xf32>
    %cst = arith.constant dense<0.000000e+00> : vector<32x128xf32>
    %11 = tpu.matmul %9, %8, %cst {dimension_numbers = #tpu.dot_dimension_numbers<[1], [0], [0], [1], [0, 0, 1, 1], [], []>} : vector<32x32xf32>, vector<32x128xf32>, vector<32x128xf32> -> vector<32x128xf32>
    %c0_9 = arith.constant 0 : index
    %c0_10 = arith.constant 0 : index
    %12 = vector.load %arg5[%c0_9, %c0_10] : memref<32x1xf32, #tpu.memory_space<vmem>>, vector<32x1xf32>
    %13 = vector.broadcast %12 : vector<32x1xf32> to vector<32x128xf32>
    %14 = arith.addf %11, %13 : vector<32x128xf32>
    %15 = math.tanh %14 : vector<32x128xf32>
    %cst_11 = arith.constant dense<0.000000e+00> : vector<32x128xf32>
    %16 = tpu.matmul %10, %15, %cst_11 {dimension_numbers = #tpu.dot_dimension_numbers<[1], [0], [0], [1], [0, 0, 1, 1], [], []>} : vector<32x32xf32>, vector<32x128xf32>, vector<32x128xf32> -> vector<32x128xf32>
    %c0_12 = arith.constant 0 : index
    %c0_13 = arith.constant 0 : index
    %17 = vector.load %arg7[%c0_12, %c0_13] : memref<32x1xf32, #tpu.memory_space<vmem>>, vector<32x1xf32>
    %18 = vector.broadcast %17 : vector<32x1xf32> to vector<32x128xf32>
    %19 = arith.addf %16, %18 : vector<32x128xf32>
    %20 = math.tanh %19 : vector<32x128xf32>
    %cst_14 = arith.constant dense<0.000000e+00> : vector<32x128xf32>
    %21 = tpu.matmul %10, %20, %cst_14 {dimension_numbers = #tpu.dot_dimension_numbers<[1], [0], [0], [1], [0, 0, 1, 1], [], []>} : vector<32x32xf32>, vector<32x128xf32>, vector<32x128xf32> -> vector<32x128xf32>
    %c0_15 = arith.constant 0 : index
    %c0_16 = arith.constant 0 : index
    %22 = vector.load %arg7[%c0_15, %c0_16] : memref<32x1xf32, #tpu.memory_space<vmem>>, vector<32x1xf32>
    %23 = vector.broadcast %22 : vector<32x1xf32> to vector<32x128xf32>
    %24 = arith.addf %21, %23 : vector<32x128xf32>
    %25 = math.tanh %24 : vector<32x128xf32>
    %c0_17 = arith.constant 0 : index
    %c0_18 = arith.constant 0 : index
    %26 = vector.load %arg8[%c0_17, %c0_18] : memref<32x1xf32, #tpu.memory_space<vmem>>, vector<32x1xf32>
    %27 = vector.broadcast %26 : vector<32x1xf32> to vector<32x128xf32>
    %28 = arith.mulf %27, %25 : vector<32x128xf32>
    %cst_19 = arith.constant dense<0.000000e+00> : vector<128xf32>
    %29 = vector.multi_reduction <add>, %28, %cst_19 [0] : vector<32x128xf32> to vector<128xf32>
    %30 = vector.shape_cast %29 : vector<128xf32> to vector<1x128xf32>
    %c0_20 = arith.constant 0 : index
    %c0_21 = arith.constant 0 : index
    %31 = vector.load %arg9[%c0_20, %c0_21] : memref<1x1xf32, #tpu.memory_space<vmem>>, vector<1x1xf32>
    %32 = vector.broadcast %31 : vector<1x1xf32> to vector<1x128xf32>
    %33 = arith.addf %30, %32 : vector<1x128xf32>
    %c0_22 = arith.constant 0 : index
    %c0_23 = arith.constant 0 : index
    %34 = vector.load %arg10[%c0_22, %c0_23] : memref<1x128xf32, #tpu.memory_space<vmem>>, vector<1x128xf32>
    tpu.vector_store %arg10[%c0_22, %c0_23], %33 {strides = array<i32>} : memref<1x128xf32, #tpu.memory_space<vmem>>, vector<1x128xf32>,
    return
  }
  func.func @transform_0(%arg0: i32) -> (i32, i32) {
    %c0_i32 = arith.constant 0 : i32
    %c0_i32_0 = arith.constant 0 : i32
    return %c0_i32, %arg0 : i32, i32
  }
  func.func @transform_1(%arg0: i32) -> (i32, i32) {
    %c0_i32 = arith.constant 0 : i32
    %c0_i32_0 = arith.constant 0 : i32
    %c0_i32_1 = arith.constant 0 : i32
    return %c0_i32, %c0_i32_0 : i32, i32
  }
  func.func @transform_2(%arg0: i32) -> (i32, i32) {
    %c0_i32 = arith.constant 0 : i32
    %c0_i32_0 = arith.constant 0 : i32
    %c0_i32_1 = arith.constant 0 : i32
    return %c0_i32, %c0_i32_0 : i32, i32
  }
  func.func @transform_3(%arg0: i32) -> (i32, i32) {
    %c0_i32 = arith.constant 0 : i32
    %c0_i32_0 = arith.constant 0 : i32
    %c0_i32_1 = arith.constant 0 : i32
    return %c0_i32, %c0_i32_0 : i32, i32
  }
  func.func @transform_4(%arg0: i32) -> (i32, i32) {
    %c0_i32 = arith.constant 0 : i32
    %c0_i32_0 = arith.constant 0 : i32
    %c0_i32_1 = arith.constant 0 : i32
    return %c0_i32, %c0_i32_0 : i32, i32
  }
  func.func @transform_5(%arg0: i32) -> (i32, i32) {
    %c0_i32 = arith.constant 0 : i32
    %c0_i32_0 = arith.constant 0 : i32
    %c0_i32_1 = arith.constant 0 : i32
    return %c0_i32, %c0_i32_0 : i32, i32
  }
  func.func @transform_6(%arg0: i32) -> (i32, i32) {
    %c0_i32 = arith.constant 0 : i32
    %c0_i32_0 = arith.constant 0 : i32
    %c0_i32_1 = arith.constant 0 : i32
    return %c0_i32, %c0_i32_0 : i32, i32
  }
  func.func @transform_7(%arg0: i32) -> (i32, i32) {
    %c0_i32 = arith.constant 0 : i32
    %c0_i32_0 = arith.constant 0 : i32
    %c0_i32_1 = arith.constant 0 : i32
    return %c0_i32, %c0_i32_0 : i32, i32
  }
  func.func @transform_8(%arg0: i32) -> (i32, i32) {
    %c0_i32 = arith.constant 0 : i32
    %c0_i32_0 = arith.constant 0 : i32
    %c0_i32_1 = arith.constant 0 : i32
    return %c0_i32, %c0_i32_0 : i32, i32
  }
  func.func @transform_9(%arg0: i32) -> (i32, i32) {
    %c0_i32 = arith.constant 0 : i32
    %c0_i32_0 = arith.constant 0 : i32
    return %c0_i32, %arg0 : i32, i32
  }
}

</mosaic_0001>

<bundles_post_ra>
// kernel: tpu_custom_call.1
= control target key start
LH: loop header
LB: loop body
LE: loop exit
PB: predicated region body
PF: predicated region fallthrough
CT: control target
= control target key end

     0   :  { %s815_s0 = inlined_call_operand.vmem [shape: f32[1,128], index: 0, kind: input, shape index: {}]   ;;  %s816_s1 = inlined_call_operand.vmem [shape: f32[32,1], index: 1, kind: input, shape index: {}]   ;;  %s817_s2 = inlined_call_operand.vmem [shape: f32[32,1], index: 2, kind: input, shape index: {}]   ;;  %s818_s3 = inlined_call_operand.vmem [shape: f32[32,32], index: 3, kind: input, shape index: {}]   ;;  %s819_s4 = inlined_call_operand.vmem [shape: f32[32,1], index: 4, kind: input, shape index: {}]   ;;  %s820_s5 = inlined_call_operand.vmem [shape: f32[32,32], index: 5, kind: input, shape index: {}]   ;;  %s821_s6 = inlined_call_operand.vmem [shape: f32[32,1], index: 6, kind: input, shape index: {}]   ;;  %s822_s7 = inlined_call_operand.vmem [shape: f32[32,1], index: 7, kind: input, shape index: {}]   ;;  %s823_s8 = inlined_call_operand.<no memory space> [shape: f32[1,1], index: 8, kind: input, shape index: {}]   ;;  %s824_s9 = inlined_call_operand.hbm [shape: f32[1,128], index: 9, kind: output, shape index: {}]  }
   0x1   :  { %v14_v0 = vstv %s823_s8 }
   0x2   :  { %15 = vst [vmem:[#allocation2] sm:$0x1] %v14_v0 }
   0x3   :  { %v73_v1 = vld [vmem:[%s817_s2 + $0x18] sm:$0xff]  ;;  %v658_v3 = vmov 0   ;;  %v38_v4 = vld [vmem:[%s816_s1 + $0x10] sm:$0xff]  ;;  %v37_v5 = vld [vmem:[%s816_s1 + $0x8] sm:$0xff] }
   0x4   :  { %v39_v2 = vld [vmem:[%s816_s1 + $0x18] sm:$0xff]  ;;  %603 = vset.pattern.permute.xlu1 %v658_v3  ;;  %602 = vset.pattern.permute.xlu0 %v658_v3  ;;  %v72_v6 = vld [vmem:[%s817_s2 + $0x10] sm:$0xff]  ;;  %v36_v7 = vld [vmem:[%s816_s1] sm:$0xff] }
   0x5   :  { %91 = vperm.xlu1 %603, %v73_v1   ;;  %57 = vperm.xlu0 %602, %v39_v2  }
   0x9   :  { %52 = vperm.xlu0 %602, %v38_v4   ;;  %47 = vperm.xlu1 %603, %v37_v5  }
   0xa   :  { %16 = vsyncpa [#allocation4], 0  ;;  %v71_v8 = vld [vmem:[%s817_s2 + $0x8] sm:$0xff]  ;;  %v70_v9 = vld [vmem:[%s817_s2] sm:$0xff]  ;;  %vm134_vm0 = vcmask 261120  }
   0xb   :  { %v113_v10 = vld [vmem:[%s819_s4 + $0x18] sm:$0xff]  ;;  %v112_v11 = vld [vmem:[%s819_s4 + $0x10] sm:$0xff]  ;;  %v111_v12 = vld [vmem:[%s819_s4 + $0x8] sm:$0xff] }
   0xc   :  { %v110_v13 = vld [vmem:[%s819_s4] sm:$0xff]  ;;  %v239_v14 = vld [vmem:[%s821_s6 + $0x18] sm:$0xff]  ;;  %v238_v15 = vld [vmem:[%s821_s6 + $0x10] sm:$0xff] }
   0xd   :  { %86 = vperm.xlu0 %602, %v72_v6   ;;  %42 = vperm.xlu1 %603, %v36_v7   ;;  %v237_v16 = vld [vmem:[%s821_s6 + $0x8] sm:$0xff]  ;;  %v236_v17 = vld [vmem:[%s821_s6] sm:$0xff]  ;;  %v452_v21 = vld [vmem:[%s822_s7 + $0x10] sm:$0xff] }
   0xe   :  { %v102_v18 = vld [vmem:[%s818_s3] sm:$0xff]  ;;  %v451_v20 = vld [vmem:[%s822_s7 + $0x8] sm:$0xff]  ;;  %v453_v22 = vld [vmem:[%s822_s7 + $0x18] sm:$0xff] }
   0xf   :  { %558 = vmatprep.mubr.msk.f32.mxu0 %vm134_vm0, %v102_v18  ;;  %v450_v19 = vld [vmem:[%s822_s7] sm:$0xff]  ;;  %v103_v45 = vld [vmem:[%s818_s3 + $0x8] sm:$0xff]  ;;  %v104_v46 = vld [vmem:[%s818_s3 + $0x10] sm:$0xff] }
  0x10   :  { %v487_v23 = vld [vmem:[#allocation2] sm:$0x1]  ;;  %v105_v47 = vld [vmem:[%s818_s3 + $0x18] sm:$0xff]  ;;  %v107_v1 = vld [vmem:[%s820_s5 + $0x8] sm:$0xff] }
  0x11   :  { %81 = vperm.xlu0 %602, %v71_v8   ;;  %76 = vperm.xlu1 %603, %v70_v9   ;;  %v513_v24 = vld [vmem:[%s815_s0] ss:$0 sm:$0xff]  ;;  %v108_v2 = vld [vmem:[%s820_s5 + $0x10] sm:$0xff]  ;;  %v109_v3 = vld [vmem:[%s820_s5 + $0x18] sm:$0xff] }
  0x12   :  { %v106_v48 = vld [vmem:[%s820_s5] sm:$0xff]  ;;  %s659_s5 = smov [#allocation3]  }
  0x13   :  { %572 = vmatprep.mubr.msk.f32.mxu1 %vm134_vm0, %v106_v48  ;;  %s505_s16 = sshll.u32 %s659_s5, 4  ;;  %s506_s16 = int_to_ptr.vmem [resolvable:$true] %s505_s16 }
  0x14   :  { %s636_s17 = scalar_lea.vmem %s506_s16, 16  ;;  %s640_s8 = scalar_lea.vmem %s506_s16, 32 }
  0x15   :  { %131 = vperm.xlu0 %602, %v113_v10   ;;  %126 = vperm.xlu1 %603, %v112_v11   ;;  %p637_p0 = scmp.ne.s32.totalorder %s506_s16, %s636_s17  ;;  %p641_p1 = scmp.lt.s32.totalorder %s506_s16, %s506_s16 }
  0x16   :  { %p642_p2 = scmp.lt.s32.totalorder %s640_s8, %s636_s17 }
  0x18   :  { %p643_p3 = por %p642_p2, %p641_p1 }
  0x19   :  { %121 = vperm.xlu0 %602, %v111_v12   ;;  %116 = vperm.xlu1 %603, %v110_v13  }
  0x1a   :  { %p644_p4 = pnand %p643_p3, %p637_p0 }
  0x1d   :  { %257 = vperm.xlu0 %602, %v239_v14   ;;  %252 = vperm.xlu1 %603, %v238_v15  }
  0x21   :  { %247 = vperm.xlu0 %602, %v237_v16   ;;  %242 = vperm.xlu1 %603, %v236_v17  }
  0x25   :  { %456 = vperm.xlu0 %602, %v450_v19   ;;  %461 = vperm.xlu1 %603, %v451_v20  }
  0x29   :  { %466 = vperm.xlu0 %602, %v452_v21   ;;  %471 = vperm.xlu1 %603, %v453_v22  }
  0x2d   :  { %490 = vperm.xlu0 %602, %v487_v23  }
  0x80   :  { %v92_v25 = vpop.permute.xlu1 %91  ;;  %v58_v26 = vpop.permute.xlu0 %57 }
  0x81   :  { %v69_v27 = vmul.f32 %v513_v24, %v58_v26 }
  0x83   :  { %v97_v28 = vadd.f32 %v92_v25, %v69_v27 }
  0x84   :  { %v53_v29 = vpop.permute.xlu0 %52  ;;  %v48_v30 = vpop.permute.xlu1 %47 }
  0x85   :  { %604 = vtanh.f32 %v97_v28  ;;  %v68_v31 = vmul.f32 %v513_v24, %v53_v29  ;;  %v67_v35 = vmul.f32 %v513_v24, %v48_v30 }
  0x88   :  { %v87_v32 = vpop.permute.xlu0 %86  ;;  %v43_v33 = vpop.permute.xlu1 %42 }
  0x89   :  { %v96_v34 = vadd.f32 %v87_v32, %v68_v31  ;;  %v66_v36 = vmul.f32 %v513_v24, %v43_v33 }
  0x8b   :  { %606 = vtanh.f32 %v96_v34 }
  0x8c   :  { %v82_v37 = vpop.permute.xlu0 %81  ;;  %v77_v38 = vpop.permute.xlu1 %76 }
  0x8d   :  { %v95_v39 = vadd.f32 %v82_v37, %v67_v35  ;;  %v94_v40 = vadd.f32 %v77_v38, %v66_v36 }
  0x8f   :  { %608 = vtanh.f32 %v95_v39 }
  0x90   :  { %610 = vtanh.f32 %v94_v40  ;;  %v132_v49 = vpop.permute.xlu0 %131  ;;  %v127_v51 = vpop.permute.xlu1 %126 }
  0x92   :  { %v605_v41 = vpop.eup %604 }
  0x93   :  { %550 = vmatprep.subr.mxu0 %v605_v41 }
  0x94   :  { %551 = vmatpush3.msra.mxu0 %v605_v41  ;;  %v122_v55 = vpop.permute.xlu0 %121  ;;  %v117_v59 = vpop.permute.xlu1 %116 }
  0x98   :  { %v607_v42 = vpop.eup %606  ;;  %v258_v4 = vpop.permute.xlu0 %257 }
  0x99   :  { %552 = vmatprep.subr.mxu0 %v607_v42  ;;  %v253_v6 = vpop.permute.xlu1 %252 }
  0x9a   :  { %553 = vmatpush3.msra.mxu0 %v607_v42  ;;  %v493_v42 = vlaneseq }
  0x9c   :  { %v609_v43 = vpop.eup %608  ;;  %v248_v10 = vpop.permute.xlu0 %247 }
  0x9d   :  { %554 = vmatprep.subr.mxu0 %v609_v43  ;;  %v611_v44 = vpop.eup %610  ;;  %v243_v14 = vpop.permute.xlu1 %242 }
  0x9e   :  { %555 = vmatpush3.msra.mxu0 %v609_v43 }
  0x9f   :  { %556 = vmatprep.subr.mxu0 %v611_v44 }
  0xa0   :  { %557 = vmatpush3.msra.mxu0 %v611_v44  ;;  %v457_v28 = vpop.permute.xlu0 %456 }
  0xa1   :  { %559 = vmatmul.mubr.msk.f32.vlgmr.msra.gmra.mxu0 %vm134_vm0, %v103_v45  ;;  %v462_v30 = vpop.permute.xlu1 %461  ;;  %v494_v45 = vshrl.u32 %v493_v42, 7 }
  0xa2   :  { %561 = vmatprep.mubr.msk.f32.mxu0 %vm134_vm0, %v104_v46 }
  0xa4   :  { %v467_v36 = vpop.permute.xlu0 %466 }
  0xa5   :  { %562 = vmatmul.mubr.msk.f32.gmra.mxu0 %vm134_vm0, %v105_v47  ;;  %v472_v39 = vpop.permute.xlu1 %471 }
  0xa6   :  { %586 = vmatprep.mubr.msk.f32.mxu0 %vm134_vm0, %v106_v48  ;;  %v495_v48 = vsub.s32 0, %v494_v45 }
 0x161   :  { %v560_v50 = vpop.f32.mrf.mxu0 }
 0x162   :  { %v219_v57 = vadd.f32 %v560_v50, %v122_v55  ;;  %v491_v50 = vpop.permute.xlu0 %490 }
 0x163   :  { %v213_v52 = vpop.f32.mrf.mxu0 }
 0x164   :  { %v214_v60 = vadd.f32 %v213_v52, %v117_v59  ;;  %v496_v52 = vrot.slane %v491_v50, %v495_v48 }
 0x165   :  { %v563_v53 = vpop.f32.mrf.mxu0 }
 0x166   :  { %v229_v54 = vadd.f32 %v563_v53, %v132_v49 }
 0x167   :  { %v223_v56 = vpop.f32.mrf.mxu0 }
 0x168   :  { %612 = vtanh.f32 %v229_v54  ;;  %v224_v58 = vadd.f32 %v223_v56, %v127_v51 }
 0x16a   :  { %614 = vtanh.f32 %v224_v58 }
 0x16b   :  { %616 = vtanh.f32 %v219_v57 }
 0x16c   :  { %618 = vtanh.f32 %v214_v60 }
 0x175   :  { %v613_v61 = vpop.eup %612 }
 0x176   :  { %564 = vmatprep.subr.mxu1 %v613_v61 }
 0x177   :  { %v615_v62 = vpop.eup %614  ;;  %565 = vmatpush3.msra.mxu1 %v613_v61 }
 0x178   :  { %566 = vmatprep.subr.mxu1 %v615_v62  ;;  %v617_v63 = vpop.eup %616 }
 0x179   :  { %567 = vmatpush3.msra.mxu1 %v615_v62  ;;  %v619_v0 = vpop.eup %618 }
 0x17a   :  { %568 = vmatprep.subr.mxu1 %v617_v63 }
 0x17b   :  { %569 = vmatpush3.msra.mxu1 %v617_v63 }
 0x17c   :  { %570 = vmatprep.subr.mxu1 %v619_v0 }
 0x17d   :  { %571 = vmatpush3.msra.mxu1 %v619_v0 }
 0x17e   :  { %573 = vmatmul.mubr.msk.f32.vlgmr.msra.gmra.mxu1 %vm134_vm0, %v107_v1 }
 0x17f   :  { %575 = vmatprep.mubr.msk.f32.mxu1 %vm134_vm0, %v108_v2 }
 0x182   :  { %576 = vmatmul.mubr.msk.f32.gmra.mxu1 %vm134_vm0, %v109_v3 }
 0x183   :  { %589 = vmatprep.mubr.msk.f32.mxu1 %vm134_vm0, %v108_v2 }
 0x23e   :  { %v574_v5 = vpop.f32.mrf.mxu1 }
 0x23f   :  { %v344_v12 = vadd.f32 %v574_v5, %v248_v10 }
 0x240   :  { %v338_v7 = vpop.f32.mrf.mxu1 }
 0x241   :  { %v339_v15 = vadd.f32 %v338_v7, %v243_v14 }
 0x242   :  { %v577_v8 = vpop.f32.mrf.mxu1 }
 0x243   :  { %v354_v9 = vadd.f32 %v577_v8, %v258_v4 }
 0x244   :  { %v348_v11 = vpop.f32.mrf.mxu1 }
 0x245   :  { %620 = vtanh.f32 %v354_v9  ;;  %v349_v13 = vadd.f32 %v348_v11, %v253_v6 }
 0x247   :  { %622 = vtanh.f32 %v349_v13 }
 0x248   :  { %624 = vtanh.f32 %v344_v12 }
 0x249   :  { %626 = vtanh.f32 %v339_v15 }
 0x252   :  { %v621_v16 = vpop.eup %620 }
 0x253   :  { %578 = vmatprep.subr.mxu0 %v621_v16  ;;  %592 = vmatprep.subr.mxu1 %v621_v16 }
 0x254   :  { %v623_v17 = vpop.eup %622  ;;  %579 = vmatpush3.msra.mxu0 %v621_v16  ;;  %596 = vmatpush3.msra.mxu1 %v621_v16 }
 0x255   :  { %580 = vmatprep.subr.mxu0 %v623_v17  ;;  %593 = vmatprep.subr.mxu1 %v623_v17  ;;  %v625_v18 = vpop.eup %624 }
 0x256   :  { %581 = vmatpush3.msra.mxu0 %v623_v17  ;;  %597 = vmatpush3.msra.mxu1 %v623_v17  ;;  %v627_v19 = vpop.eup %626 }
 0x257   :  { %582 = vmatprep.subr.mxu0 %v625_v18  ;;  %594 = vmatprep.subr.mxu1 %v625_v18 }
 0x258   :  { %583 = vmatpush3.msra.mxu0 %v625_v18  ;;  %598 = vmatpush3.msra.mxu1 %v625_v18 }
 0x259   :  { %584 = vmatprep.subr.mxu0 %v627_v19  ;;  %595 = vmatprep.subr.mxu1 %v627_v19 }
 0x25a   :  { %585 = vmatpush3.msra.mxu0 %v627_v19  ;;  %599 = vmatpush3.msra.mxu1 %v627_v19 }
 0x25b   :  { %587 = vmatmul.mubr.msk.f32.vlgmr.msra.gmra.mxu0 %vm134_vm0, %v107_v1  ;;  %590 = vmatmul.mubr.msk.f32.vlgmr.msra.gmra.mxu1 %vm134_vm0, %v109_v3 }
 0x31b   :  { %v588_v20 = vpop.f32.mrf.mxu0  ;;  %v591_v21 = vpop.f32.mrf.mxu1 }
 0x31c   :  { %v433_v22 = vadd.f32 %v588_v20, %v248_v10  ;;  %v443_v25 = vadd.f32 %v591_v21, %v258_v4 }
 0x31d   :  { %v427_v23 = vpop.f32.mrf.mxu0  ;;  %v437_v24 = vpop.f32.mrf.mxu1 }
 0x31e   :  { %628 = vtanh.f32 %v433_v22  ;;  %v428_v26 = vadd.f32 %v427_v23, %v243_v14  ;;  %v438_v27 = vadd.f32 %v437_v24, %v253_v6 }
 0x320   :  { %630 = vtanh.f32 %v428_v26 }
 0x321   :  { %632 = vtanh.f32 %v438_v27 }
 0x322   :  { %634 = vtanh.f32 %v443_v25 }
 0x32b   :  { %v629_v29 = vpop.eup %628 }
 0x32c   :  { %v475_v33 = vmul.f32 %v629_v29, %v462_v30 }
 0x32d   :  { %v631_v31 = vpop.eup %630 }
 0x32e   :  { %v633_v32 = vpop.eup %632  ;;  %v474_v34 = vmul.f32 %v631_v31, %v457_v28 }
 0x32f   :  { %v635_v35 = vpop.eup %634  ;;  %v476_v37 = vmul.f32 %v633_v32, %v467_v36 }
 0x330   :  { %v478_v38 = vadd.f32 %v475_v33, %v474_v34  ;;  %v477_v40 = vmul.f32 %v635_v35, %v472_v39 }
 0x332   :  { %v479_v41 = vadd.f32 %v478_v38, %v476_v37 }
 0x334   :  { %v480_v43 = vadd.f32 %v479_v41, %v477_v40 }
 0x336   :  { %v481_v44 = vrot.slane %v480_v43, 4 }
 0x338   :  { %v482_v46 = vadd.f32 %v481_v44, %v480_v43 }
 0x33a   :  { %v483_v47 = vrot.slane %v482_v46, 2 }
 0x33c   :  { %v484_v49 = vadd.f32 %v483_v47, %v482_v46 }
 0x33e   :  { %v485_v51 = vrot.slane %v484_v49, 1 }
 0x340   :  { %v486_v53 = vadd.f32 %v485_v51, %v484_v49 }
 0x342   :  { %v497_v54 = vadd.f32 %v496_v52, %v486_v53 }
 0x344   :  { %498 = vst [vmem:[#allocation3] sm:$0x1] %v497_v54 }
 0x345   :  { %647 = shalt.err (!%p644_p4)
}
 0x346   :  { %508 = dma.vmem_to_hbm [thread:$0]  %s506_s16, 16, %s824_s9, [#allocation4]  }
 0x347   :  { %656 = dma.done.wait [#allocation4], 16  }
 0x348   :  { %657 = vsyncadd [#allocation4], 4294967280 }
 0x349   :  { %512 = vsyncpa [#allocation4], 1 }

</bundles_post_ra>
